<compile_context>
chip_gen: v7x
topology: tpu7x:2x2x1
jax: 0.10.0
libtpu: 0.0.40
codegen_flags: <defaults>
</compile_context>

<pallas_src>
import functools

import jax
import jax.numpy as jnp
from jax.experimental import pallas as pl
from jax.experimental.pallas import tpu as pltpu


def skiplinear_kernel(x_ref, rep_ref, w_ref, b_ref, o_ref):
    # x_ref:   (TB, n_in)   f32 batch tile
    # rep_ref: (n_in, n_out) f32 0/1 replication matrix (VMEM-resident, constant)
    # w_ref:   (1, n_out)    f32 flattened per-output scales (constant)
    # b_ref:   (1, n_out)    f32 flattened per-output biases (constant)
    # o_ref:   (TB, n_out)   f32 output tile (lane-dense last dim)
    x_rep = jnp.dot(x_ref[...], rep_ref[...], preferred_element_type=jnp.float32)
    o_ref[...] = (x_rep * w_ref[...] + b_ref[...]).astype(o_ref.dtype)


def _pick_block_rows(B, n_in, n_out, max_rows, tile_budget_bytes=16 << 20):
    """Largest batch tile that keeps double-buffered x/out tiles under budget."""
    per_row = 2 * 4 * (n_in + n_out)  # 2 pipeline buffers, f32 x-row + out-row
    tb = min(max_rows, max(8, tile_budget_bytes // max(per_row, 1)))
    if tb >= B:
        return B                      # full batch: block == full dim, always legal
    return max(8, (tb // 8) * 8)      # partial tile: keep sublane (8) alignment


@functools.partial(jax.jit, static_argnames=("block_rows",))
def skip_linear_forward(x, core_w, core_b, *, block_rows=512):
    """out[b, i*n+j] = x[b, i] * core_w[i, j] + core_b[i, j]."""
    B, n_in = x.shape
    n_in_w, n = core_w.shape
    assert n_in_w == n_in
    n_out = n_in * n

    # --- glue (pure JAX, outside the hot loop) --------------------------------
    w_flat = core_w.reshape(1, n_out).astype(jnp.float32)
    b_flat = core_b.reshape(1, n_out).astype(jnp.float32)
    # 0/1 replication matrix: rep[i, i*n + j] = 1
    rep = (jnp.eye(n_in, dtype=jnp.float32)[:, :, None]
           * jnp.ones((1, 1, n), jnp.float32)).reshape(n_in, n_out)

    # --- tiling ---------------------------------------------------------------
    tb = _pick_block_rows(B, n_in, n_out, block_rows)
    grid = (pl.cdiv(B, tb),)

    cost = pl.CostEstimate(
        flops=2 * B * n_in * n_out + 2 * B * n_out,
        transcendentals=0,
        bytes_accessed=4 * (B * n_in + B * n_out + n_in * n_out + 2 * n_out),
    )

    return pl.pallas_call(
        skiplinear_kernel,
        out_shape=jax.ShapeDtypeStruct((B, n_out), jnp.float32),
        grid_spec=pltpu.PrefetchScalarGridSpec(
            num_scalar_prefetch=0,
            grid=grid,
            in_specs=[
                # batch-tiled activations
                pl.BlockSpec((tb, n_in), lambda i: (i, 0)),
                # parameters: constant index_map -> DMA'd once, VMEM-resident
                pl.BlockSpec((n_in, n_out), lambda i: (0, 0)),
                pl.BlockSpec((1, n_out), lambda i: (0, 0)),
                pl.BlockSpec((1, n_out), lambda i: (0, 0)),
            ],
            out_specs=pl.BlockSpec((tb, n_out), lambda i: (i, 0)),
        ),
        compiler_params=pltpu.CompilerParams(
            dimension_semantics=("parallel",),      # megacore split on v7x
            vmem_limit_bytes=32 * 1024 * 1024,      # tiles budgeted to fit w/ headroom
        ),
        cost_estimate=cost,
    )(x, rep, w_flat, b_flat)


def skip_linear_ref(x, core_w, core_b):
    """Plain-JAX reference matching the PyTorch forward exactly."""
    B = x.shape[0]
    out = x[:, :, None] * core_w[None, :, :] + core_b[None, :, :]
    return out.reshape(B, -1)


if __name__ == "__main__":
    batch = 16
    n_in = 4
    n_out = 128          # n = 32 outputs per Core; lane-dense (multiple of 128)
    n = n_out // n_in

    key = jax.random.PRNGKey(0)
    kx, kw, kb = jax.random.split(key, 3)
    x = jax.random.normal(kx, (batch, n_in), dtype=jnp.float32)
    # Per-core Linear(1, n) params (torch default init range for in_features=1).
    core_w = jax.random.uniform(kw, (n_in, n), jnp.float32, minval=-1.0, maxval=1.0)
    core_b = jax.random.uniform(kb, (n_in, n), jnp.float32, minval=-1.0, maxval=1.0)

    # block_rows=8 -> 2 grid steps in the demo, exercising the batch pipeline.
    out = skip_linear_forward(x, core_w, core_b, block_rows=8)
    out = jax.block_until_ready(out)

    ref = skip_linear_ref(x, core_w, core_b)
    assert out.shape == (batch, n_out)
    assert jnp.allclose(out, ref, atol=1e-5, rtol=1e-5)

    print("KERNEL_OK")
</pallas_src>

<mosaic_0001>
module attributes {stable_mosaic.version = 11 : i64} {
  func.func @skiplinear_kernel(%arg0: i32, %arg1: memref<8x4xf32, #tpu.memory_space<vmem>>, %arg2: memref<4x128xf32, #tpu.memory_space<vmem>>, %arg3: memref<1x128xf32, #tpu.memory_space<vmem>>, %arg4: memref<1x128xf32, #tpu.memory_space<vmem>>, %arg5: memref<8x128xf32, #tpu.memory_space<vmem>>) attributes {dimension_semantics = [#tpu.dimension_semantics<parallel>], iteration_bounds = array<i64: 2>, scalar_prefetch = 0 : i64, scratch_operands = 0 : i64, tpu.core_type = #tpu.core_type<tc>, window_params = [{transform_indices = @transform_0, window_bounds = array<i64: 8, 4>}, {pipeline_mode = #tpu.pipeline_mode<synchronous>, transform_indices = @transform_1, window_bounds = array<i64: 4, 128>}, {pipeline_mode = #tpu.pipeline_mode<synchronous>, transform_indices = @transform_2, window_bounds = array<i64: 1, 128>}, {pipeline_mode = #tpu.pipeline_mode<synchronous>, transform_indices = @transform_3, window_bounds = array<i64: 1, 128>}, {transform_indices = @transform_4, window_bounds = array<i64: 8, 128>}]} {
    %c0 = arith.constant 0 : index
    %c0_0 = arith.constant 0 : index
    %0 = vector.load %arg1[%c0, %c0_0] : memref<8x4xf32, #tpu.memory_space<vmem>>, vector<8x4xf32>
    %c0_1 = arith.constant 0 : index
    %c0_2 = arith.constant 0 : index
    %1 = vector.load %arg2[%c0_1, %c0_2] : memref<4x128xf32, #tpu.memory_space<vmem>>, vector<4x128xf32>
    %cst = arith.constant dense<0.000000e+00> : vector<8x128xf32>
    %2 = tpu.matmul %0, %1, %cst {dimension_numbers = #tpu.dot_dimension_numbers<[1], [0], [0], [1], [0, 0, 1, 1], [], []>} : vector<8x4xf32>, vector<4x128xf32>, vector<8x128xf32> -> vector<8x128xf32>
    %c0_3 = arith.constant 0 : index
    %c0_4 = arith.constant 0 : index
    %3 = vector.load %arg3[%c0_3, %c0_4] : memref<1x128xf32, #tpu.memory_space<vmem>>, vector<1x128xf32>
    %4 = vector.broadcast %3 : vector<1x128xf32> to vector<8x128xf32>
    %5 = arith.mulf %2, %4 : vector<8x128xf32>
    %c0_5 = arith.constant 0 : index
    %c0_6 = arith.constant 0 : index
    %6 = vector.load %arg4[%c0_5, %c0_6] : memref<1x128xf32, #tpu.memory_space<vmem>>, vector<1x128xf32>
    %7 = vector.broadcast %6 : vector<1x128xf32> to vector<8x128xf32>
    %8 = arith.addf %5, %7 : vector<8x128xf32>
    %c0_7 = arith.constant 0 : index
    %c0_8 = arith.constant 0 : index
    %9 = vector.load %arg5[%c0_7, %c0_8] : memref<8x128xf32, #tpu.memory_space<vmem>>, vector<8x128xf32>
    tpu.vector_store %arg5[%c0_7, %c0_8], %8 {strides = array<i32>} : memref<8x128xf32, #tpu.memory_space<vmem>>, vector<8x128xf32>,
    return
  }
  func.func @transform_0(%arg0: i32) -> (i32, i32) {
    %c0_i32 = arith.constant 0 : i32
    %c0_i32_0 = arith.constant 0 : i32
    return %arg0, %c0_i32 : i32, i32
  }
  func.func @transform_1(%arg0: i32) -> (i32, i32) {
    %c0_i32 = arith.constant 0 : i32
    %c0_i32_0 = arith.constant 0 : i32
    %c0_i32_1 = arith.constant 0 : i32
    return %c0_i32, %c0_i32_0 : i32, i32
  }
  func.func @transform_2(%arg0: i32) -> (i32, i32) {
    %c0_i32 = arith.constant 0 : i32
    %c0_i32_0 = arith.constant 0 : i32
    %c0_i32_1 = arith.constant 0 : i32
    return %c0_i32, %c0_i32_0 : i32, i32
  }
  func.func @transform_3(%arg0: i32) -> (i32, i32) {
    %c0_i32 = arith.constant 0 : i32
    %c0_i32_0 = arith.constant 0 : i32
    %c0_i32_1 = arith.constant 0 : i32
    return %c0_i32, %c0_i32_0 : i32, i32
  }
  func.func @transform_4(%arg0: i32) -> (i32, i32) {
    %c0_i32 = arith.constant 0 : i32
    %c0_i32_0 = arith.constant 0 : i32
    return %arg0, %c0_i32 : i32, i32
  }
}

</mosaic_0001>

<bundles_post_ra>
// kernel: mul.5
= control target key start
LH: loop header
LB: loop body
LE: loop exit
PB: predicated region body
PF: predicated region fallthrough
CT: control target
= control target key end

     0   :  { %s70_s0 = inlined_call_operand.vmem [shape: f32[4,4], index: 0, kind: input, shape index: {}]   ;;  %s71_s1 = inlined_call_operand.vmem [shape: f32[4,4,32], index: 1, kind: output, shape index: {}]  }
   0x1   :  { %v32_v0 = vld [vmem:[%s70_s0 + $0x2] ss:$0 sm:$0xff]  ;;  %v4_v1 = vld [vmem:[%s70_s0] ss:$0 sm:$0xff]  ;;  %v34_v2 = vld [vmem:[%s70_s0 + $0x3] ss:$0 sm:$0xff] }
   0x2   :  { %19 = vbcast.lane.b32.xlu1 %v32_v0, 256  ;;  %6 = vbcast.lane.b32.xlu0 %v4_v1, 256  ;;  %v30_v3 = vld [vmem:[%s70_s0 + $0x1] ss:$0 sm:$0xff] }
   0x6   :  { %26 = vbcast.lane.b32.xlu1 %v34_v2, 256  ;;  %12 = vbcast.lane.b32.xlu0 %v30_v3, 256 }
  0x74   :  { %v20_v4 = vpop.permute.xlu1 %19  ;;  %v7_v5 = vpop.permute.xlu0 %6 }
  0x75   :  { %33 = vst [vmem:[%s71_s1 + $0x8] sm:$0xf] %v20_v4  ;;  %8 = vst [vmem:[%s71_s1] sm:$0xf] %v7_v5 }
  0x78   :  { %v27_v6 = vpop.permute.xlu1 %26  ;;  %v13_v7 = vpop.permute.xlu0 %12 }
  0x79   :  { %35 = vst [vmem:[%s71_s1 + $0xc] sm:$0xf] %v27_v6  ;;  %31 = vst [vmem:[%s71_s1 + $0x4] sm:$0xf] %v13_v7 }

// kernel: skip_linear_forward.1
= control target key start
LH: loop header
LB: loop body
LE: loop exit
PB: predicated region body
PF: predicated region fallthrough
CT: control target
= control target key end

     0   :  { %9 = vsyncpa [#allocation3], 0  ;;  %s626_s0 = inlined_call_operand.vmem [shape: f32[16,4], index: 0, kind: input, shape index: {}]   ;;  %s627_s1 = inlined_call_operand.vmem [shape: f32[4,128], index: 1, kind: input, shape index: {}]   ;;  %s628_s2 = inlined_call_operand.vmem [shape: f32[1,128], index: 2, kind: input, shape index: {}]   ;;  %s629_s3 = inlined_call_operand.vmem [shape: f32[1,128], index: 3, kind: input, shape index: {}]   ;;  %s630_s4 = inlined_call_operand.hbm [shape: f32[16,128], index: 4, kind: output, shape index: {}]  }
   0x1   :  { %11 = vsyncpa [#allocation3 + $0x1], 0  ;;  %s517_s15 = smov 0   ;;  %s519_s16 = smov 0  }
   0x2   :  { %s521_s17 = smov 0   ;;  %s523_s18 = smov 0  }
   0x3 LB: > { %s538_s19 = sadd.s32 4294967295, %s487_s18   ;;  %s363_s20 = sadd.s32 4294967294, %s487_s18   ;;  %s487_s18 = sphi %s523_s18, %s636_s18   ;;  %s483_s17 = sphi %s521_s17, %s635_s17   ;;  %s479_s16 = sphi %s519_s16, %s634_s16   ;;  %s475_s15 = sphi %s517_s15, %s633_s15  }
   0x4   : > { %s542_s21 = sadd.s32 1, %s487_s18   ;;  %s113_s22 = sadd.s32 1, %s483_s17 }
   0x5   : > { %s110_s23 = ssub.s32 %s487_s18, %s542_s21  ;;  %p123_p0 = scmp.ne.s32.totalorder %s483_s17, %s479_s16 }
   0x6   : > { %p111_p1 = scmp.eq.s32.totalorder %s110_s23, 0  ;;  %p124_p2 = scmp.eq.s32.totalorder %s538_s19, 1 }
   0x7   : > { %p129_p3 = scmp.ne.s32.totalorder %s479_s16, %s475_s15  ;;  %p130_p4 = scmp.eq.s32.totalorder %s363_s20, 1 }
   0x8   : > { %s553_s24 = scalar_select %p111_p1, %s483_s17, %s113_s22  }
   0x9   : > { %p555_p5 = por %p124_p2, %p123_p0  ;;  %p559_p6 = por %p130_p4, %p129_p3 }
   0xa   : > { %p366_p7 = scmp.ge.s32.totalorder %s487_s18, 1  ;;  %p164_p8 = scmp.lt.s32.totalorder %s487_s18, 3 }
   0xc   : > { %p165_p9 = pnand %p366_p7, %p164_p8 }
   0xd   : > { %v194_v0 = vld [vmem:[%s627_s1] sm:$0xf] (!%p165_p9)  ;;  %vm199_vm0 = vcmask (!%p165_p9), 1043456   ;;  %p189_p10 = scmp.lt.s32.totalorder (!%p165_p9), %s538_s19, 1  ;;  %v489_v1 = vmov (!%p165_p9), 0.0   ;;  %vm490_vm1 = vmmov (!%p165_p9), 0  }
   0xe   : > { %168 = sbr.rel (%p165_p9) target bundleno = 256 (0x100), region = 36  ;;  %379 = vmatprep.subr.mxu0 (!%p165_p9), %v489_v1  ;;  %381 = vmatprep.mubr.msk.f32.mxu0 (!%p165_p9), %vm490_vm1, %v489_v1  ;;  %vm195_vm2 = vcmask (!%p165_p9), 31744   ;;  %s186_s8 = sand.u32 (!%p165_p9), 1, %s479_s16   ;;  %v371_v3 = vld [vmem:[%s628_s2] ss:$0 sm:$0xff] (!%p165_p9) }
   0xf   : > { %380 = vmatpush3.msk.msra.mxu0 (!%p165_p9), %vm199_vm0, %v194_v0  ;;  %s367_s9 = sshll.u32 (!%p165_p9), %s186_s8, 3  ;;  %v372_v5 = vld [vmem:[%s629_s3] ss:$0 sm:$0xff] (!%p165_p9)  ;;  %s374_s14 = sshll.u32 (!%p165_p9), %s538_s19, 7 }
  0x10   : > { %s188_s20 = scalar_lea.vmem (!%p165_p9), [#allocation2], %s367_s9  ;;  %s584_s28 = scalar_lea.hbm (!%p165_p9), %s630_s4, %s374_s14 }
  0x11   : > { %s304_s22 = sshll.u32 (!%p165_p9), %s188_s20, 4  ;;  %s586_s22 = int_to_ptr.vmem [resolvable:$true] %s304_s22 }
  0x15   : > { %s190_s29 = scalar_select %p189_p10, %s538_s19, 1 }
  0x16   : > { %s491_s19 = smov [#allocation2]  }
  0x17   : > { %s368_s30 = sshll.u32 %s190_s29, 3  ;;  %s291_s29 = scalar_lea.sflag [#allocation3], %s186_s8 }
  0x18   : > { %s192_s7 = scalar_lea.vmem %s626_s0, %s368_s30  ;;  %s425_s30 = scalar_lea.vmem %s586_s22, 128 }
  0x19   : > { %v193_v2 = vld [vmem:[%s192_s7] sm:$0xff]  ;;  %p426_p11 = scmp.ne.s32.totalorder %s586_s22, %s425_s30  ;;  %s429_s5 = sshll.u32 %s491_s19, 4  ;;  %s430_s5 = int_to_ptr.vmem [resolvable:$false] %s429_s5 }
  0x1a   : > { %382 = vmatmul.mubr.msk.f32.vlgmr.msra.gmra.mrb[0].mxu0 %vm195_vm2, %v193_v2  ;;  %s431_s6 = scalar_lea.vmem %s430_s5, 256  ;;  %p432_p0 = scmp.lt.s32.totalorder %s586_s22, %s430_s5 }
  0x1b   : > { %p427_p12 = pnand %p426_p11, %p555_p5  ;;  %p433_p1 = scmp.lt.s32.totalorder %s431_s6, %s425_s30 }
  0x1d   : > { %p428_p13 = pneg %p427_p12  ;;  %p434_p2 = por %p433_p1, %p432_p0 }
  0x1f   : > { %p435_p3 = pnand %p434_p2, %p428_p13 }
  0xed   : > { %v269_v4 = vpop.f32.mrb[0].mxu0 }
  0xee   : > { %v280_v6 = vmul.f32 %v371_v3, %v269_v4  ;;  %v383_v7 = vpop.f32.mrb[1].mxu0 }
  0xf0   : > { %v288_v8 = vadd.f32 %v372_v5, %v280_v6 }
  0xf2   : > { %289 = vst [vmem:[%s188_s20] sm:$0xff] %v288_v8 }
  0xf3   : > { %438 = shalt.err (!%p435_p3)
}
  0xf4   : > { %s439_s7 = scalar_lea.hbm %s584_s28, 128  ;;  %s443_s10 = scalar_lea.hbm %s630_s4, 256 }
  0xf5   : > { %p440_p4 = scmp.ne.s32.totalorder %s584_s28, %s439_s7  ;;  %p444_p9 = scmp.lt.u32.totalorder %s584_s28, %s630_s4 }
  0xf6   : > { %p445_p10 = scmp.lt.u32.totalorder %s443_s10, %s439_s7  ;;  %p447_p12 = scmp.lt.u32.totalorder %s439_s7, %s584_s28 }
  0xf7   : > { %p441_p7 = pnand %p440_p4, %p555_p5 }
  0xf8   : > { %p446_p11 = por %p445_p10, %p444_p9 }
  0xf9   : > { %p442_p8 = pneg %p441_p7 }
  0xfa   : > { %p448_p13 = por %p447_p12, %p446_p11 }
  0xfc   : > { %p449_p0 = pnand %p448_p13, %p442_p8 }
  0xfe   : > { %452 = shalt.err (!%p449_p0)
}
  0xff   : > { %384 = dma.vmem_to_hbm [thread:$0]  (%p555_p5), %s586_s22, 128, %s584_s28, %s291_s29  }
 0x100 PF: > { %p390_p1 = scmp.ge.s32.totalorder %s487_s18, 2  ;;  %s316_s13 = sand.u32 1, %s475_s15  }
 0x101   : > { %s317_s14 = scalar_lea.sflag [#allocation3], %s316_s13 }
 0x102   : > { %p387_p2 = pnand %p390_p1, %p559_p6 }
 0x104   : > { %470 = dma.done.wait (!%p387_p2), %s317_s14, 128  }
 0x105   : > { %472 = vsyncadd (!%p387_p2), %s317_s14, 4294967168  ;;  %p14_p3 = scmp.ge.s32.totalorder %s542_s21, 4   ;;  %s633_s15 = smov %s479_s16 }
 0x106   : > { %s634_s16 = smov %s483_s17  ;;  %s635_s17 = smov %s553_s24 }
 0x107   : > { %s636_s18 = smov %s542_s21  ;;  %16 = sbr.rel (!%p14_p3) target bundleno = 3 (0x3), region = 71 }
 0x10e   :  { %322 = vsyncpa [#allocation3], 1 }
 0x10f   :  { %324 = vsyncpa [#allocation3 + $0x1], 1 }

</bundles_post_ra>
